<compile_context>
chip_gen: v5e
topology: v5e:2x2
jax: 0.10.0
libtpu: 0.0.40
codegen_flags: <defaults>
</compile_context>

<pallas_src>
import functools

import jax
import jax.numpy as jnp
from jax.experimental import pallas as pl
from jax.experimental.pallas import tpu as pltpu

OUT_FEATURES = 5
OUT_PAD = 128  # lane-dense padded output width
IN_FEATURES = 10


def meta_learner_kernel(x_ref, w1_ref, b1_ref, w2_ref, b2_ref, w3_ref, b3_ref, o_ref):
    # x_ref: (TB, 10) bf16;  w*: bf16 (in, out);  b*: (1, out) f32;  o_ref: (TB, 128) f32
    x = x_ref[...]
    h1 = jnp.dot(x, w1_ref[...], preferred_element_type=jnp.float32)          # (TB, h1) f32
    h1 = jnp.maximum(h1 + b1_ref[...], 0.0)                                    # ReLU in f32
    h2 = jnp.dot(h1.astype(w2_ref.dtype), w2_ref[...],
                 preferred_element_type=jnp.float32)                           # (TB, h2) f32
    h2 = jnp.maximum(h2 + b2_ref[...], 0.0)
    out = jnp.dot(h2.astype(w3_ref.dtype), w3_ref[...],
                  preferred_element_type=jnp.float32)                          # (TB, 128) f32
    o_ref[...] = (out + b3_ref[...]).astype(o_ref.dtype)


def _round_up(x, m):
    return ((x + m - 1) // m) * m


@functools.partial(jax.jit, static_argnames=("tile_batch",))
def meta_learner_forward(x, params, *, tile_batch=1024):
    """x: (B, 10) float32.  params: (w1, b1, w2, b2, w3, b3) with W stored as (in, out)."""
    w1, b1, w2, b2, w3, b3 = params
    B = x.shape[0]
    h1 = w1.shape[1]
    h2 = w2.shape[1]

    # Batch tiling: one large tile if B fits, otherwise tiles of `tile_batch` rows.
    if B <= tile_batch:
        tb = _round_up(max(B, 8), 8)
        b_pad = tb
    else:
        tb = tile_batch
        b_pad = _round_up(B, tb)
    grid = (b_pad // tb,)

    # Streamed / matmul operands in bf16 (f32 accumulation inside the kernel).
    compute_dtype = jnp.bfloat16
    x_p = jnp.zeros((b_pad, IN_FEATURES), compute_dtype).at[:B].set(x.astype(compute_dtype))
    w1_c = w1.astype(compute_dtype)
    w2_c = w2.astype(compute_dtype)
    # Lane-dense output: zero-pad fc3 to 128 output features.
    w3_p = jnp.zeros((h2, OUT_PAD), compute_dtype).at[:, :OUT_FEATURES].set(
        w3.astype(compute_dtype))
    b3_p = jnp.zeros((1, OUT_PAD), jnp.float32).at[:, :OUT_FEATURES].set(
        b3.astype(jnp.float32))
    b1_c = b1.astype(jnp.float32)
    b2_c = b2.astype(jnp.float32)

    flops = 2 * b_pad * (IN_FEATURES * h1 + h1 * h2 + h2 * OUT_PAD)
    bytes_accessed = (
        x_p.size * x_p.dtype.itemsize
        + b_pad * OUT_PAD * 4
        + w1_c.size * 2 + w2_c.size * 2 + w3_p.size * 2
        + b1_c.size * 4 + b2_c.size * 4 + b3_p.size * 4
    )

    out_padded = pl.pallas_call(
        meta_learner_kernel,
        out_shape=jax.ShapeDtypeStruct((b_pad, OUT_PAD), jnp.float32),
        grid_spec=pltpu.PrefetchScalarGridSpec(
            num_scalar_prefetch=0,
            grid=grid,
            in_specs=[
                pl.BlockSpec((tb, IN_FEATURES), lambda i: (i, 0)),   # x: streamed per tile
                pl.BlockSpec((IN_FEATURES, h1), lambda i: (0, 0)),   # w1: resident
                pl.BlockSpec((1, h1), lambda i: (0, 0)),             # b1: resident
                pl.BlockSpec((h1, h2), lambda i: (0, 0)),            # w2: resident
                pl.BlockSpec((1, h2), lambda i: (0, 0)),             # b2: resident
                pl.BlockSpec((h2, OUT_PAD), lambda i: (0, 0)),       # w3 (padded): resident
                pl.BlockSpec((1, OUT_PAD), lambda i: (0, 0)),        # b3 (padded): resident
            ],
            out_specs=pl.BlockSpec((tb, OUT_PAD), lambda i: (i, 0)),
        ),
        compiler_params=pltpu.CompilerParams(
            dimension_semantics=("parallel",),
        ),
        cost_estimate=pl.CostEstimate(
            flops=flops, transcendentals=0, bytes_accessed=bytes_accessed),
    )(x_p, w1_c, b1_c, w2_c, b2_c, w3_p, b3_p)

    return out_padded[:B, :OUT_FEATURES]


def init_params(key, meta_hidden_dim1, meta_hidden_dim2):
    """Deterministic synthetic init mimicking nn.Linear shapes (stored transposed: (in, out))."""
    ks = jax.random.split(key, 6)

    def linear(kw, kb, fan_in, fan_out):
        bound = 1.0 / jnp.sqrt(fan_in)
        w = jax.random.uniform(kw, (fan_in, fan_out), jnp.float32, -bound, bound)
        b = jax.random.uniform(kb, (1, fan_out), jnp.float32, -bound, bound)
        return w, b

    w1, b1 = linear(ks[0], ks[1], IN_FEATURES, meta_hidden_dim1)
    w2, b2 = linear(ks[2], ks[3], meta_hidden_dim1, meta_hidden_dim2)
    w3, b3 = linear(ks[4], ks[5], meta_hidden_dim2, OUT_FEATURES)
    return (w1, b1, w2, b2, w3, b3)


def meta_learner_ref_bf16(x, params):
    """Reference matching the kernel's numerics (bf16 matmul operands, f32 accumulation)."""
    w1, b1, w2, b2, w3, b3 = params
    c = jnp.bfloat16
    h1 = jnp.dot(x.astype(c), w1.astype(c), preferred_element_type=jnp.float32) + b1
    h1 = jnp.maximum(h1, 0.0)
    h2 = jnp.dot(h1.astype(c), w2.astype(c), preferred_element_type=jnp.float32) + b2
    h2 = jnp.maximum(h2, 0.0)
    return jnp.dot(h2.astype(c), w3.astype(c), preferred_element_type=jnp.float32) + b3


def meta_learner_ref_f32(x, params):
    w1, b1, w2, b2, w3, b3 = params
    h1 = jnp.maximum(x @ w1 + b1, 0.0)
    h2 = jnp.maximum(h1 @ w2 + b2, 0.0)
    return h2 @ w3 + b3


if __name__ == "__main__":
    key = jax.random.PRNGKey(0)
    k_x, k_x2, k_p = jax.random.split(key, 3)

    meta_hidden_dim1 = 32
    meta_hidden_dim2 = 32
    params = init_params(k_p, meta_hidden_dim1, meta_hidden_dim2)

    # Small batch (single tile).
    B = 8
    x = jax.random.normal(k_x, (B, IN_FEATURES), dtype=jnp.float32)
    out = jax.block_until_ready(meta_learner_forward(x, params))
    assert out.shape == (B, OUT_FEATURES)
    ref = meta_learner_ref_bf16(x, params)
    assert jnp.allclose(out, ref, atol=2e-3, rtol=2e-3)
    assert jnp.allclose(out, meta_learner_ref_f32(x, params), atol=5e-2, rtol=5e-2)

    # Larger (still small) batch exercising the multi-tile pipelined path + padding.
    B2 = 200
    x2 = jax.random.normal(k_x2, (B2, IN_FEATURES), dtype=jnp.float32)
    out2 = jax.block_until_ready(meta_learner_forward(x2, params, tile_batch=64))
    assert out2.shape == (B2, OUT_FEATURES)
    ref2 = meta_learner_ref_bf16(x2, params)
    assert jnp.allclose(out2, ref2, atol=2e-3, rtol=2e-3)

    print("KERNEL_OK")
</pallas_src>

<mosaic_0001>
module attributes {stable_mosaic.version = 11 : i64} {
  func.func @meta_learner_kernel(%arg0: i32, %arg1: memref<8x10xbf16, #tpu.memory_space<vmem>>, %arg2: memref<10x32xbf16, #tpu.memory_space<vmem>>, %arg3: memref<1x32xf32, #tpu.memory_space<vmem>>, %arg4: memref<32x32xbf16, #tpu.memory_space<vmem>>, %arg5: memref<1x32xf32, #tpu.memory_space<vmem>>, %arg6: memref<32x128xbf16, #tpu.memory_space<vmem>>, %arg7: memref<1x128xf32, #tpu.memory_space<vmem>>, %arg8: memref<8x128xf32, #tpu.memory_space<vmem>>) attributes {dimension_semantics = [#tpu.dimension_semantics<parallel>], iteration_bounds = array<i64: 1>, scalar_prefetch = 0 : i64, scratch_operands = 0 : i64, tpu.core_type = #tpu.core_type<tc>, window_params = [{transform_indices = @transform_0, window_bounds = array<i64: 8, 10>}, {pipeline_mode = #tpu.pipeline_mode<synchronous>, transform_indices = @transform_1, window_bounds = array<i64: 10, 32>}, {pipeline_mode = #tpu.pipeline_mode<synchronous>, transform_indices = @transform_2, window_bounds = array<i64: 1, 32>}, {pipeline_mode = #tpu.pipeline_mode<synchronous>, transform_indices = @transform_3, window_bounds = array<i64: 32, 32>}, {pipeline_mode = #tpu.pipeline_mode<synchronous>, transform_indices = @transform_4, window_bounds = array<i64: 1, 32>}, {pipeline_mode = #tpu.pipeline_mode<synchronous>, transform_indices = @transform_5, window_bounds = array<i64: 32, 128>}, {pipeline_mode = #tpu.pipeline_mode<synchronous>, transform_indices = @transform_6, window_bounds = array<i64: 1, 128>}, {transform_indices = @transform_7, window_bounds = array<i64: 8, 128>}]} {
    %c0 = arith.constant 0 : index
    %c0_0 = arith.constant 0 : index
    %0 = vector.load %arg1[%c0, %c0_0] : memref<8x10xbf16, #tpu.memory_space<vmem>>, vector<8x10xbf16>
    %c0_1 = arith.constant 0 : index
    %c0_2 = arith.constant 0 : index
    %1 = vector.load %arg2[%c0_1, %c0_2] : memref<10x32xbf16, #tpu.memory_space<vmem>>, vector<10x32xbf16>
    %cst = arith.constant dense<0.000000e+00> : vector<8x32xf32>
    %2 = tpu.matmul %0, %1, %cst {dimension_numbers = #tpu.dot_dimension_numbers<[1], [0], [0], [1], [0, 0, 1, 1], [], []>} : vector<8x10xbf16>, vector<10x32xbf16>, vector<8x32xf32> -> vector<8x32xf32>
    %c0_3 = arith.constant 0 : index
    %c0_4 = arith.constant 0 : index
    %3 = vector.load %arg3[%c0_3, %c0_4] : memref<1x32xf32, #tpu.memory_space<vmem>>, vector<1x32xf32>
    %4 = vector.broadcast %3 : vector<1x32xf32> to vector<8x32xf32>
    %5 = arith.addf %2, %4 : vector<8x32xf32>
    %cst_5 = arith.constant 0.000000e+00 : f32
    %6 = vector.broadcast %cst_5 : f32 to vector<8x32xf32>
    %7 = arith.maximumf %5, %6 : vector<8x32xf32>
    %8 = arith.truncf %7 : vector<8x32xf32> to vector<8x32xbf16>
    %c0_6 = arith.constant 0 : index
    %c0_7 = arith.constant 0 : index
    %9 = vector.load %arg4[%c0_6, %c0_7] : memref<32x32xbf16, #tpu.memory_space<vmem>>, vector<32x32xbf16>
    %cst_8 = arith.constant dense<0.000000e+00> : vector<8x32xf32>
    %10 = tpu.matmul %8, %9, %cst_8 {dimension_numbers = #tpu.dot_dimension_numbers<[1], [0], [0], [1], [0, 0, 1, 1], [], []>} : vector<8x32xbf16>, vector<32x32xbf16>, vector<8x32xf32> -> vector<8x32xf32>
    %c0_9 = arith.constant 0 : index
    %c0_10 = arith.constant 0 : index
    %11 = vector.load %arg5[%c0_9, %c0_10] : memref<1x32xf32, #tpu.memory_space<vmem>>, vector<1x32xf32>
    %12 = vector.broadcast %11 : vector<1x32xf32> to vector<8x32xf32>
    %13 = arith.addf %10, %12 : vector<8x32xf32>
    %cst_11 = arith.constant 0.000000e+00 : f32
    %14 = vector.broadcast %cst_11 : f32 to vector<8x32xf32>
    %15 = arith.maximumf %13, %14 : vector<8x32xf32>
    %16 = arith.truncf %15 : vector<8x32xf32> to vector<8x32xbf16>
    %c0_12 = arith.constant 0 : index
    %c0_13 = arith.constant 0 : index
    %17 = vector.load %arg6[%c0_12, %c0_13] : memref<32x128xbf16, #tpu.memory_space<vmem>>, vector<32x128xbf16>
    %cst_14 = arith.constant dense<0.000000e+00> : vector<8x128xf32>
    %18 = tpu.matmul %16, %17, %cst_14 {dimension_numbers = #tpu.dot_dimension_numbers<[1], [0], [0], [1], [0, 0, 1, 1], [], []>} : vector<8x32xbf16>, vector<32x128xbf16>, vector<8x128xf32> -> vector<8x128xf32>
    %c0_15 = arith.constant 0 : index
    %c0_16 = arith.constant 0 : index
    %19 = vector.load %arg7[%c0_15, %c0_16] : memref<1x128xf32, #tpu.memory_space<vmem>>, vector<1x128xf32>
    %20 = vector.broadcast %19 : vector<1x128xf32> to vector<8x128xf32>
    %21 = arith.addf %18, %20 : vector<8x128xf32>
    %c0_17 = arith.constant 0 : index
    %c0_18 = arith.constant 0 : index
    %22 = vector.load %arg8[%c0_17, %c0_18] : memref<8x128xf32, #tpu.memory_space<vmem>>, vector<8x128xf32>
    tpu.vector_store %arg8[%c0_17, %c0_18], %21 {strides = array<i32>} : memref<8x128xf32, #tpu.memory_space<vmem>>, vector<8x128xf32>,
    return
  }
  func.func @transform_0(%arg0: i32) -> (i32, i32) {
    %c0_i32 = arith.constant 0 : i32
    %c0_i32_0 = arith.constant 0 : i32
    return %arg0, %c0_i32 : i32, i32
  }
  func.func @transform_1(%arg0: i32) -> (i32, i32) {
    %c0_i32 = arith.constant 0 : i32
    %c0_i32_0 = arith.constant 0 : i32
    %c0_i32_1 = arith.constant 0 : i32
    return %c0_i32, %c0_i32_0 : i32, i32
  }
  func.func @transform_2(%arg0: i32) -> (i32, i32) {
    %c0_i32 = arith.constant 0 : i32
    %c0_i32_0 = arith.constant 0 : i32
    %c0_i32_1 = arith.constant 0 : i32
    return %c0_i32, %c0_i32_0 : i32, i32
  }
  func.func @transform_3(%arg0: i32) -> (i32, i32) {
    %c0_i32 = arith.constant 0 : i32
    %c0_i32_0 = arith.constant 0 : i32
    %c0_i32_1 = arith.constant 0 : i32
    return %c0_i32, %c0_i32_0 : i32, i32
  }
  func.func @transform_4(%arg0: i32) -> (i32, i32) {
    %c0_i32 = arith.constant 0 : i32
    %c0_i32_0 = arith.constant 0 : i32
    %c0_i32_1 = arith.constant 0 : i32
    return %c0_i32, %c0_i32_0 : i32, i32
  }
  func.func @transform_5(%arg0: i32) -> (i32, i32) {
    %c0_i32 = arith.constant 0 : i32
    %c0_i32_0 = arith.constant 0 : i32
    %c0_i32_1 = arith.constant 0 : i32
    return %c0_i32, %c0_i32_0 : i32, i32
  }
  func.func @transform_6(%arg0: i32) -> (i32, i32) {
    %c0_i32 = arith.constant 0 : i32
    %c0_i32_0 = arith.constant 0 : i32
    %c0_i32_1 = arith.constant 0 : i32
    return %c0_i32, %c0_i32_0 : i32, i32
  }
  func.func @transform_7(%arg0: i32) -> (i32, i32) {
    %c0_i32 = arith.constant 0 : i32
    %c0_i32_0 = arith.constant 0 : i32
    return %arg0, %c0_i32 : i32, i32
  }
}

</mosaic_0001>

<bundles_post_ra>
// kernel: meta_learner_forward.1
= control target key start
LH: loop header
LB: loop body
LE: loop exit
PB: predicated region body
PF: predicated region fallthrough
CT: control target
= control target key end

     0   :  { %vm44_vm0 = vcmask 1044480   ;;  %s287_s0 = inlined_call_operand.vmem [shape: bf16[8,10], index: 0, kind: input, shape index: {}]   ;;  %s288_s1 = inlined_call_operand.vmem [shape: bf16[10,32], index: 1, kind: input, shape index: {}]   ;;  %s289_s2 = inlined_call_operand.vmem [shape: f32[1,32], index: 2, kind: input, shape index: {}]   ;;  %s290_s3 = inlined_call_operand.vmem [shape: bf16[32,32], index: 3, kind: input, shape index: {}]   ;;  %s291_s4 = inlined_call_operand.vmem [shape: f32[1,32], index: 4, kind: input, shape index: {}]   ;;  %s292_s5 = inlined_call_operand.vmem [shape: bf16[32,128], index: 5, kind: input, shape index: {}]   ;;  %s293_s6 = inlined_call_operand.vmem [shape: f32[1,128], index: 6, kind: input, shape index: {}]   ;;  %s294_s7 = inlined_call_operand.hbm [shape: f32[8,128], index: 7, kind: output, shape index: {}]  }
   0x1   :  { %v157_v0 = vld [vmem:[%s288_s1] sm:$0xf]  ;;  %v178_v1 = vld [vmem:[%s288_s1] sm:$0x10] }
   0x2   :  { %v158_v2 = vor.u32 %v178_v1, %v157_v0 }
   0x3   :  { %12 = vsyncpa [#allocation3], 0  ;;  %v28_v4 = vld [vmem:[%s287_s0] sm:$0xf]  ;;  %vm40_vm1 = vcmask 80896   ;;  %v180_v5 = vld [vmem:[%s290_s3 + $0x8] sm:$0xff] }
   0x4   :  { %v46_v3 = vsel %vm44_vm0, %v158_v2, 0  ;;  %93 = vmatpush.bf16.msra.mxu1 %v180_v5  ;;  %v179_v6 = vld [vmem:[%s290_s3] sm:$0xff]  ;;  %vm83_vm2 = vcmask 261120   ;;  %v182_v13 = vld [vmem:[%s292_s5 + $0x8] sm:$0xff]  ;;  %s213_s17 = smov [#allocation2]  }
   0x5   :  { %55 = vmatpush.bf16.msra.mxu0 %v46_v3  ;;  %v184_v7 = vld [vmem:[%s289_s2] ss:$0 sm:$0xff]  ;;  %131 = vmatpush.bf16.msra.mxu2 %v182_v13  ;;  %s144_s18 = sshll.u32 %s213_s17, 4  ;;  %s145_s18 = int_to_ptr.vmem [resolvable:$true] %s144_s18 }
   0x6   :  { %v181_v14 = vld [vmem:[%s292_s5] sm:$0xff]  ;;  %s146_s5 = sshll.u32 %s294_s7, 4  ;;  %s147_s5 = int_to_ptr.hbm [resolvable:$true] %s146_s5 }
   0x7   :  { %v185_v15 = vld [vmem:[%s291_s4] ss:$0 sm:$0xff] }
   0x8   :  { %159 = vmatmul.msk.bf16.vlgmr.msra.gmra.mxu0 %vm40_vm1, %v28_v4  ;;  %94 = vmatpush.bf16.msra.mxu1 %v179_v6  ;;  %v186_v21 = vld [vmem:[%s293_s6] ss:$0 sm:$0xff] }
   0x9   :  { %132 = vmatpush.bf16.msra.mxu2 %v181_v14 }
  0x85   :  { %v57_v8 = vpop.f32.mrf.mxu0 }
  0x86   :  { %v58_v9 = vadd.f32 %v184_v7, %v57_v8 }
  0x88   :  { %v61_v10 = vmax.f32 %v58_v9, 0.0 }
  0x8a   :  { %v62_v11 = vpack.c.bf16 %v61_v10, %v61_v10 }
  0x8c   :  { %168 = vmatmul.msk.bf16.vlgmr.msra.gmra.mxu1 %vm83_vm2, %v62_v11 }
  0x8d   :  { %v59_v12 = vpop.f32.mrf.mxu0 }
 0x109   :  { %v96_v16 = vpop.f32.mrf.mxu1 }
 0x10a   :  { %v97_v17 = vadd.f32 %v185_v15, %v96_v16 }
 0x10c   :  { %v100_v18 = vmax.f32 %v97_v17, 0.0 }
 0x10e   :  { %v101_v19 = vpack.c.bf16 %v100_v18, %v100_v18 }
 0x110   :  { %177 = vmatmul.msk.bf16.vlgmr.msra.gmra.mxu2 %vm83_vm2, %v101_v19 }
 0x111   :  { %v98_v20 = vpop.f32.mrf.mxu1 }
 0x193   :  { %v134_v22 = vpop.f32.mrf.mxu2 }
 0x194   :  { %v135_v23 = vadd.f32 %v186_v21, %v134_v22 }
 0x196   :  { %138 = vst [vmem:[#allocation2] sm:$0xff] %v135_v23 }
 0x197   :  { %149 = dma.vmem_to_hbm [thread:$0]  %s145_s18, 128, %s147_s5, [#allocation3]  }
 0x19b   :  { %v136_v24 = vpop.f32.mrf.mxu2 }
 0x19c   :  { %211 = dma.done.wait [#allocation3], 128  }
 0x19d   :  { %212 = vsyncadd [#allocation3], 4294967168 }
 0x19e   :  { %154 = vsyncpa [#allocation3], 1 }

</bundles_post_ra>
